<compile_context>
chip_gen: v7x
topology: tpu7x:2x2x1
jax: 0.10.0
libtpu: 0.0.40
codegen_flags: <defaults>
</compile_context>

<pallas_src>
import functools
import math

import jax
import jax.numpy as jnp
from jax.experimental import pallas as pl
from jax.experimental.pallas import tpu as pltpu


# ----------------------------------------------------------------------------
# Pallas kernel: one (TN, dim) tile of the sinusoidal timestep embedding.
#   tab_ref: (3, dim)  resident table — row 0: freq, row 1: phase, row 2: valid
#   t_ref:   (TN, 1)   float32 timesteps for this tile's rows
#   o_ref:   (TN, dim) output tile
# ----------------------------------------------------------------------------
def _timestep_embedding_kernel(tab_ref, t_ref, o_ref, *, odd):
    freq = tab_ref[0:1, :]                       # (1, dim)
    phase = tab_ref[1:2, :]                      # (1, dim)
    # (TN,1) * (1,dim) + (1,dim) -> (TN,dim): one mul+add then one cos per elem
    emb = jnp.cos(t_ref[...] * freq + phase)
    if odd:                                      # static: zero the pad column
        emb = emb * tab_ref[2:3, :]
    o_ref[...] = emb.astype(o_ref.dtype)         # single unmasked lane-dense store


def _round_up(x, m):
    return ((x + m - 1) // m) * m


def timestep_embedding_pallas(t, dim, max_period=10000, *, max_rows=1024,
                              out_dtype=jnp.float32):
    """Pallas TPU equivalent of timestep_embedding(t, dim, max_period)."""
    assert dim >= 2, "dim must be >= 2"
    t = jnp.asarray(t)
    assert t.ndim == 1, "timesteps must be a 1-D array"
    n = int(t.shape[0])
    half = dim // 2
    pad = dim - 2 * half                         # 1 when dim is odd, else 0

    t_col = t.astype(jnp.float32).reshape(n, 1)

    # (3, dim) table: freq / phase / valid rows (freq built exactly as the ref).
    freqs_half = jnp.exp(
        -math.log(max_period) * jnp.arange(half, dtype=jnp.float32) / half)
    zpad = jnp.zeros((pad,), jnp.float32)
    freq_row = jnp.concatenate([freqs_half, freqs_half, zpad])
    phase_row = jnp.concatenate(
        [jnp.zeros((half,), jnp.float32),
         jnp.full((half,), -math.pi / 2.0, jnp.float32), zpad])
    valid_row = jnp.concatenate([jnp.ones((2 * half,), jnp.float32), zpad])
    table = jnp.stack([freq_row, phase_row, valid_row])     # (3, dim) f32

    # Row-tile selection:
    #   n <= 8           -> single full-array block.
    #   otherwise        -> exactly 2 grid steps (megacore sharding on v7x),
    #                       capped at `max_rows` and at a VMEM budget so the
    #                       double-buffered output stays <= ~12 MiB everywhere.
    out_itemsize = jnp.dtype(out_dtype).itemsize
    if n <= 8:
        tn = n
    else:
        vmem_rows = max(8, (((12 << 20) // (2 * dim * out_itemsize)) // 8) * 8)
        cap_rows = min(max_rows, vmem_rows)
        tn = min(cap_rows, _round_up((n + 1) // 2, 8))
    grid = (pl.cdiv(n, tn),)

    kernel = functools.partial(_timestep_embedding_kernel, odd=bool(pad))
    cost = pl.CostEstimate(
        flops=3 * n * dim,
        transcendentals=n * dim,
        bytes_accessed=4 * n + 4 * 3 * dim + out_itemsize * n * dim)

    return pl.pallas_call(
        kernel,
        out_shape=jax.ShapeDtypeStruct((n, dim), out_dtype),
        grid=grid,
        in_specs=[
            pl.BlockSpec((3, dim), lambda i: (0, 0)),   # resident table
            pl.BlockSpec((tn, 1), lambda i: (i, 0)),    # timestep column tile
        ],
        out_specs=pl.BlockSpec((tn, dim), lambda i: (i, 0)),
        compiler_params=pltpu.CompilerParams(
            dimension_semantics=("parallel",)),
        cost_estimate=cost,
    )(table, t_col)


class TimestepPallas:
    """Mirror of the PyTorch Timestep nn.Module."""

    def __init__(self, dim):
        self.dim = dim

    def __call__(self, t):
        return timestep_embedding_pallas(t, self.dim)


# ----------------------------------------------------------------------------
# Pure-JAX reference (mirrors the PyTorch code path, repeat_only=False)
# ----------------------------------------------------------------------------
def timestep_embedding_ref(t, dim, max_period=10000):
    half = dim // 2
    freqs = jnp.exp(
        -math.log(max_period) * jnp.arange(half, dtype=jnp.float32) / half)
    args = t.astype(jnp.float32)[:, None] * freqs[None]
    emb = jnp.concatenate([jnp.cos(args), jnp.sin(args)], axis=-1)
    if dim % 2:
        emb = jnp.concatenate([emb, jnp.zeros_like(emb[:, :1])], axis=-1)
    return emb


# ----------------------------------------------------------------------------
# Demo / smoke test
# ----------------------------------------------------------------------------
if __name__ == "__main__":
    key = jax.random.PRNGKey(0)
    k1, k2 = jax.random.split(key)

    # Case 1: realistic diffusion timesteps (up to 1000), dim=256.
    #   n=16 -> tn=8, grid=(2,): two "parallel" row tiles.
    # Tolerance note: the sin half is computed as cos(x - pi/2); at |args|~1e3
    # the f32 argument rounding (0.5*ulp(1000) ~= 3e-5 per op) plus range-
    # reduction differences bound the deviation well below 5e-4.  Real bugs
    # (wrong freqs / swapped halves) would produce O(1) errors.
    N, DIM = 16, 256
    t = jax.random.uniform(k1, (N,), jnp.float32) * 1000.0
    emb = TimestepPallas(DIM)(t)
    jax.block_until_ready(emb)
    ref = timestep_embedding_ref(t, DIM)
    assert emb.shape == (N, DIM), emb.shape
    err1 = float(jnp.max(jnp.abs(emb - ref)))
    assert jnp.allclose(emb, ref, rtol=1e-5, atol=5e-4), err1

    # Case 2: larger batch with a partial last tile (n=257 -> tn=136, grid=(2,)),
    # moderate args so the match is tight.
    N3, DIM3 = 257, 256
    t3 = jax.random.uniform(k2, (N3,), jnp.float32) * 50.0
    emb3 = timestep_embedding_pallas(t3, DIM3)
    jax.block_until_ready(emb3)
    ref3 = timestep_embedding_ref(t3, DIM3)
    err3 = float(jnp.max(jnp.abs(emb3 - ref3)))
    assert emb3.shape == (N3, DIM3), emb3.shape
    assert jnp.allclose(emb3, ref3, rtol=1e-5, atol=2e-5), err3

    # Case 3: odd dim + tiny batch (single full-array block) — exercises the
    # valid-row zero pad column; tight tolerance at small args.
    N2, DIM2 = 2, 33
    t2 = jnp.arange(N2, dtype=jnp.float32) * 37.5
    emb2 = timestep_embedding_pallas(t2, DIM2)
    jax.block_until_ready(emb2)
    ref2 = timestep_embedding_ref(t2, DIM2)
    err2 = float(jnp.max(jnp.abs(emb2 - ref2)))
    assert emb2.shape == (N2, DIM2), emb2.shape
    assert jnp.allclose(emb2, ref2, rtol=1e-5, atol=2e-5), err2
    assert float(jnp.abs(emb2[:, -1]).max()) == 0.0   # odd-dim zero column

    # Case 4: bf16 output (halves HBM writeback when the consumer accepts it);
    # in-kernel math stays f32, cast only at the final store.
    emb_bf = timestep_embedding_pallas(t, DIM, out_dtype=jnp.bfloat16)
    jax.block_until_ready(emb_bf)
    assert emb_bf.dtype == jnp.bfloat16
    assert jnp.allclose(emb_bf.astype(jnp.float32), ref, rtol=1e-2, atol=1e-2)

    print("KERNEL_OK")
</pallas_src>

<mosaic_0001>
module attributes {stable_mosaic.version = 11 : i64} {
  func.func @_timestep_embedding_kernel(%arg0: i32, %arg1: memref<3x256xf32, #tpu.memory_space<vmem>>, %arg2: memref<8x1xf32, #tpu.memory_space<vmem>>, %arg3: memref<8x256xf32, #tpu.memory_space<vmem>>) attributes {dimension_semantics = [#tpu.dimension_semantics<parallel>], iteration_bounds = array<i64: 2>, scalar_prefetch = 0 : i64, scratch_operands = 0 : i64, tpu.core_type = #tpu.core_type<tc>, window_params = [{pipeline_mode = #tpu.pipeline_mode<synchronous>, transform_indices = @transform_0, window_bounds = array<i64: 3, 256>}, {transform_indices = @transform_1, window_bounds = array<i64: 8, 1>}, {transform_indices = @transform_2, window_bounds = array<i64: 8, 256>}]} {
    %c0 = arith.constant 0 : index
    %c0_0 = arith.constant 0 : index
    %0 = vector.load %arg1[%c0, %c0_0] : memref<3x256xf32, #tpu.memory_space<vmem>>, vector<1x256xf32>
    %c1 = arith.constant 1 : index
    %c0_1 = arith.constant 0 : index
    %1 = vector.load %arg1[%c1, %c0_1] : memref<3x256xf32, #tpu.memory_space<vmem>>, vector<1x256xf32>
    %c0_2 = arith.constant 0 : index
    %c0_3 = arith.constant 0 : index
    %2 = vector.load %arg2[%c0_2, %c0_3] : memref<8x1xf32, #tpu.memory_space<vmem>>, vector<8x1xf32>
    %3 = vector.broadcast %2 : vector<8x1xf32> to vector<8x256xf32>
    %4 = vector.broadcast %0 : vector<1x256xf32> to vector<8x256xf32>
    %5 = arith.mulf %3, %4 : vector<8x256xf32>
    %6 = vector.broadcast %1 : vector<1x256xf32> to vector<8x256xf32>
    %7 = arith.addf %5, %6 : vector<8x256xf32>
    %8 = math.cos %7 : vector<8x256xf32>
    %c0_4 = arith.constant 0 : index
    %c0_5 = arith.constant 0 : index
    %9 = vector.load %arg3[%c0_4, %c0_5] : memref<8x256xf32, #tpu.memory_space<vmem>>, vector<8x256xf32>
    tpu.vector_store %arg3[%c0_4, %c0_5], %8 {strides = array<i32>} : memref<8x256xf32, #tpu.memory_space<vmem>>, vector<8x256xf32>,
    return
  }
  func.func @transform_0(%arg0: i32) -> (i32, i32) {
    %c0_i32 = arith.constant 0 : i32
    %c0_i32_0 = arith.constant 0 : i32
    %c0_i32_1 = arith.constant 0 : i32
    return %c0_i32, %c0_i32_0 : i32, i32
  }
  func.func @transform_1(%arg0: i32) -> (i32, i32) {
    %c0_i32 = arith.constant 0 : i32
    %c0_i32_0 = arith.constant 0 : i32
    return %arg0, %c0_i32 : i32, i32
  }
  func.func @transform_2(%arg0: i32) -> (i32, i32) {
    %c0_i32 = arith.constant 0 : i32
    %c0_i32_0 = arith.constant 0 : i32
    return %arg0, %c0_i32 : i32, i32
  }
}

</mosaic_0001>

<bundles_post_ra>
// kernel: tpu_custom_call.1
= control target key start
LH: loop header
LB: loop body
LE: loop exit
PB: predicated region body
PF: predicated region fallthrough
CT: control target
= control target key end

     0   :  { %7 = vsyncpa [#allocation3], 0  ;;  %s815_s0 = inlined_call_operand.vmem [shape: f32[3,256], index: 0, kind: input, shape index: {}]   ;;  %s816_s1 = inlined_call_operand.vmem [shape: f32[16,1], index: 1, kind: input, shape index: {}]   ;;  %s817_s2 = inlined_call_operand.hbm [shape: f32[16,256], index: 2, kind: output, shape index: {}]  }
   0x1   :  { %9 = vsyncpa [#allocation3 + $0x1], 0  ;;  %s627_s9 = smov 0   ;;  %s629_s10 = smov 0  }
   0x2   :  { %s631_s11 = smov 0   ;;  %s633_s12 = smov 0  }
   0x3 LB: > { %s648_s13 = sadd.s32 4294967295, %s602_s12   ;;  %s456_s14 = sadd.s32 4294967294, %s602_s12   ;;  %s602_s12 = sphi %s633_s12, %s827_s12   ;;  %s598_s11 = sphi %s631_s11, %s826_s11   ;;  %s594_s10 = sphi %s629_s10, %s825_s10   ;;  %s590_s9 = sphi %s627_s9, %s824_s9  }
   0x4   : > { %s652_s15 = sadd.s32 1, %s602_s12   ;;  %s69_s16 = sadd.s32 1, %s598_s11 }
   0x5   : > { %s66_s17 = ssub.s32 %s602_s12, %s652_s15  ;;  %p79_p0 = scmp.ne.s32.totalorder %s598_s11, %s594_s10 }
   0x6   : > { %p67_p1 = scmp.eq.s32.totalorder %s66_s17, 0  ;;  %p80_p2 = scmp.eq.s32.totalorder %s648_s13, 1 }
   0x7   : > { %p85_p3 = scmp.ne.s32.totalorder %s594_s10, %s590_s9  ;;  %p86_p4 = scmp.eq.s32.totalorder %s456_s14, 1 }
   0x8   : > { %s663_s18 = scalar_select %p67_p1, %s598_s11, %s69_s16  }
   0x9   : > { %p665_p5 = por %p80_p2, %p79_p0  ;;  %p669_p6 = por %p86_p4, %p85_p3 }
   0xa   : > { %p459_p7 = scmp.ge.s32.totalorder %s602_s12, 1  ;;  %p114_p8 = scmp.lt.s32.totalorder %s602_s12, 3 }
   0xc   : > { %p115_p9 = pnand %p459_p7, %p114_p8 }
   0xd   : > { %p135_p10 = scmp.lt.s32.totalorder (!%p115_p9), %s648_s13, 1  ;;  %v604_v0 = vmov (!%p115_p9), 0   ;;  %v149_v2 = vlaneseq (!%p115_p9)  ;;  %v139_v6 = vld [vmem:[%s815_s0] ss:$4 sm:$0x3] (!%p115_p9)  ;;  %s132_s30 = sand.u32 (!%p115_p9), 1, %s594_s10  }
   0xe   : > { %118 = sbr.rel (%p115_p9) target bundleno = 261 (0x105), region = 28  ;;  %531 = vset.pattern.permute.xlu0 (!%p115_p9), %v604_v0  ;;  %v462_v7 = vld [vmem:[%s815_s0 + $0x1] ss:$4 sm:$0x3] (!%p115_p9)  ;;  %v605_v37 = vmov (!%p115_p9), 683565275  }
   0xf   : > { %v150_v3 = vshrl.u32 (!%p115_p9), %v149_v2, 7  ;;  %v606_v41 = vmov (!%p115_p9), 2475754826   ;;  %v607_v43 = vmov (!%p115_p9), 2131351028   ;;  %s460_s3 = sshll.u32 (!%p115_p9), %s132_s30, 4 }
  0x10   : > { %v608_v45 = vmov (!%p115_p9), 2102212464   ;;  %v609_v47 = vmov (!%p115_p9), 920167782   ;;  %v610_v54 = vmov (!%p115_p9), 1326507024  }
  0x11   : > { %v151_v4 = vsub.s32 (!%p115_p9), 0, %v150_v3  ;;  %v155_v5 = vsub.s32 (!%p115_p9), 1, %v150_v3  ;;  %s134_s4 = scalar_lea.vmem (!%p115_p9), [#allocation2], %s460_s3  ;;  %s476_s5 = sshll.u32 (!%p115_p9), %s648_s13, 8 }
  0x12   : > { %s397_s6 = sshll.u32 (!%p115_p9), %s134_s4, 4  ;;  %s771_s14 = scalar_lea.hbm (!%p115_p9), %s817_s2, %s476_s5  ;;  %s773_s6 = int_to_ptr.vmem [resolvable:$true] %s397_s6 }
  0x13   : > { %v152_v8 = vrot.slane (!%p115_p9), %v139_v6, %v151_v4  ;;  %v156_v9 = vrot.slane (!%p115_p9), %v139_v6, %v155_v5  ;;  %v165_v10 = vrot.slane (!%p115_p9), %v462_v7, %v151_v4  ;;  %v169_v11 = vrot.slane (!%p115_p9), %v462_v7, %v155_v5  ;;  %s540_s16 = scalar_lea.vmem (!%p115_p9), %s773_s6, 256  ;;  %s611_s17 = smov (!%p115_p9), [#allocation2]  }
  0x14   : > { %p541_p11 = scmp.ne.s32.totalorder (!%p115_p9), %s773_s6, %s540_s16 }
  0x15   : > { %s136_s21 = scalar_select %p135_p10, %s648_s13, 1 }
  0x16   : > { %s383_s13 = scalar_lea.sflag [#allocation3], %s132_s30  ;;  %p542_p12 = pnand %p541_p11, %p665_p5 }
  0x17   : > { %s461_s22 = sshll.u32 %s136_s21, 3  ;;  %s544_s21 = sshll.u32 %s611_s17, 4  ;;  %s545_s21 = int_to_ptr.vmem [resolvable:$false] %s544_s21 }
  0x18   : > { %s138_s25 = scalar_lea.vmem %s816_s1, %s461_s22  ;;  %p543_p13 = pneg %p542_p12 }
  0x19   : > { %v142_v1 = vld [vmem:[%s138_s25] sm:$0xff]  ;;  %s546_s22 = scalar_lea.vmem %s545_s21, 512  ;;  %p547_p0 = scmp.lt.s32.totalorder %s773_s6, %s545_s21 }
  0x1a   : > { %145 = vperm.xlu0 %531, %v142_v1   ;;  %p548_p1 = scmp.lt.s32.totalorder %s546_s22, %s540_s16 }
  0x1c   : > { %p549_p2 = por %p548_p1, %p547_p0 }
  0x1e   : > { %p550_p3 = pnand %p549_p2, %p543_p13 }
  0x99   : > { %v146_v12 = vpop.permute.xlu0 %145 }
  0x9a   : > { %v159_v13 = vmul.f32 %v152_v8, %v146_v12  ;;  %v160_v14 = vmul.f32 %v156_v9, %v146_v12 }
  0x9c   : > { %v686_v15 = vadd.f32 %v165_v10, %v159_v13  ;;  %v688_v16 = vadd.f32 %v169_v11, %v160_v14 }
  0x9e   : > { %v174_v17 = vand.u32 2147483647, %v686_v15  ;;  %v177_v18 = vand.u32 2139095040, %v686_v15  ;;  %v280_v19 = vand.u32 2139095040, %v688_v16  ;;  %v277_v22 = vand.u32 2147483647, %v688_v16 }
  0x9f   : > { %vm176_vm14 = vcmp.lt.s32.totalorder %v686_v15, 0 }
  0xa0   : > { %v178_v20 = vshrl.u32 %v177_v18, 23  ;;  %v181_v21 = vand.u32 8388607, %v174_v17  ;;  %v281_v23 = vshrl.u32 %v280_v19, 23  ;;  %v698_v28 = vand.u32 8388607, %v277_v22 }
  0xa1   : > { %vm741_vm15 = vcmp.le.f32.partialorder %v174_v17, 0.7853982 }
  0xa2   : > { %v463_v24 = vadd.s32 4294967169, %v178_v20  ;;  %v467_v25 = vadd.s32 4294967169, %v281_v23  ;;  %v182_v27 = vor.u32 8388608, %v181_v21  ;;  %v285_v35 = vor.u32 8388608, %v698_v28 }
  0xa4   : > { %v184_v26 = vadd.s32 1, %v463_v24  ;;  %v287_v29 = vadd.s32 1, %v467_v25  ;;  %v700_v34 = vshll.u32 %v182_v27, 8 }
  0xa6   : > { %vm185_vm0 = vcmp.gt.s32.totalorder %v184_v26, 0  ;;  %vm288_vm1 = vcmp.gt.s32.totalorder %v287_v29, 0 }
  0xa7   : > { %v186_v30 = vsel %vm185_vm0, %v184_v26, 0  ;;  %v289_v33 = vsel %vm288_vm1, %v287_v29, 0  ;;  %v325_v29 = vshll.u32 %v285_v35, 8  ;;  %vm279_vm0 = vcmp.lt.s32.totalorder %v688_v16, 0 }
  0xa8   : > { %v187_v31 = vshrl.u32 %v186_v30, 5  ;;  %v188_v32 = vand.u32 31, %v186_v30  ;;  %v703_v39 = vshrl.u32 %v289_v33, 5  ;;  %v291_v40 = vand.u32 31, %v289_v33 }
  0xa9   : > { %vm753_vm1 = vcmp.le.f32.partialorder %v277_v22, 0.7853982 }
  0xaa   : > { %v189_v36 = vsub.s32 32, %v188_v32  ;;  %v191_v38 = vshll.u32 %v605_v37, %v188_v32  ;;  %v194_v42 = vshll.u32 %v606_v41, %v188_v32  ;;  %v197_v44 = vshll.u32 %v607_v43, %v188_v32 }
  0xab   : > { %v200_v46 = vshll.u32 %v608_v45, %v188_v32  ;;  %v203_v48 = vshll.u32 %v609_v47, %v188_v32  ;;  %vm206_vm2 = vcmp.lt.s32.totalorder %v187_v31, 1  ;;  %vm207_vm3 = vcmp.lt.s32.totalorder %v187_v31, 2 }
  0xac   : > { %v192_v49 = vshrl.u32 %v606_v41, %v189_v36  ;;  %v195_v50 = vshrl.u32 %v607_v43, %v189_v36  ;;  %v198_v51 = vshrl.u32 %v608_v45, %v189_v36  ;;  %v190_v52 = vshrl.u32 %v605_v37, %v189_v36 }
  0xad   : > { %v201_v53 = vshrl.u32 %v609_v47, %v189_v36  ;;  %v204_v55 = vshrl.u32 %v610_v54, %v189_v36  ;;  %v292_v59 = vsub.s32 32, %v291_v40  ;;  %vm208_vm4 = vcmp.lt.s32.totalorder %v187_v31, 3 }
  0xae   : > { %v193_v56 = vor.u32 %v192_v49, %v191_v38  ;;  %v196_v57 = vor.u32 %v195_v50, %v194_v42  ;;  %v199_v58 = vor.u32 %v198_v51, %v197_v44  ;;  %vm209_vm5 = vcmp.lt.s32.totalorder %v187_v31, 4 }
  0xaf   : > { %v202_v60 = vor.u32 %v201_v53, %v200_v46  ;;  %v205_v61 = vor.u32 %v204_v55, %v203_v48  ;;  %v294_v5 = vshll.u32 %v605_v37, %v291_v40  ;;  %v295_v8 = vshrl.u32 %v606_v41, %v292_v59 }
  0xb0   : > { %v210_v62 = vsel %vm206_vm2, %v190_v52, %v193_v56  ;;  %v211_v63 = vsel %vm209_vm5, %v199_v58, 2102212464  ;;  %v214_v0 = vsel %vm206_vm2, %v193_v56, %v196_v57  ;;  %v218_v1 = vsel %vm206_vm2, %v196_v57, %v199_v58 }
  0xb1   : > { %v212_v2 = vsel %vm208_vm4, %v196_v57, %v211_v63  ;;  %v215_v3 = vsel %vm209_vm5, %v202_v60, 920167782  ;;  %v219_v4 = vsel %vm209_vm5, %v205_v61, 1326507024  ;;  %v297_v9 = vshll.u32 %v606_v41, %v291_v40 }
  0xb2   : > { %v216_v6 = vsel %vm208_vm4, %v199_v58, %v215_v3  ;;  %v220_v7 = vsel %vm208_vm4, %v202_v60, %v219_v4  ;;  %v213_v10 = vsel %vm207_vm3, %v210_v62, %v212_v2  ;;  %v298_v13 = vshrl.u32 %v607_v43, %v292_v59 }
  0xb3   : > { %v217_v11 = vsel %vm207_vm3, %v214_v0, %v216_v6  ;;  %v221_v12 = vsel %vm207_vm3, %v218_v1, %v220_v7  ;;  %v296_v21 = vor.u32 %v295_v8, %v294_v5  ;;  %v300_v24 = vshll.u32 %v607_v43, %v291_v40 }
  0xb4   : > { %v712_v14 = vmul.u32.u64.low %v700_v34, %v221_v12  ;;  %v713_v18 = vmul.u32.u64.high %v700_v34, %v221_v12, %v712_v14  ;;  %v716_v19 = vmul.u32.u64.low %v700_v34, %v217_v11  ;;  %v717_v20 = vmul.u32.u64.high %v700_v34, %v217_v11, %v716_v19 }
  0xb5   : > { %v299_v23 = vor.u32 %v298_v13, %v297_v9  ;;  %v301_v25 = vshrl.u32 %v608_v45, %v292_v59  ;;  %v303_v26 = vshll.u32 %v608_v45, %v291_v40  ;;  %v304_v27 = vshrl.u32 %v609_v47, %v292_v59 }
  0xb6   : > { %v307_v28 = vshrl.u32 %v610_v54, %v292_v59  ;;  %v229_v30 = vmul.u32 %v700_v34, %v213_v10  ;;  %v293_v31 = vshrl.u32 %v605_v37, %v292_v59  ;;  %v306_v33 = vshll.u32 %v609_v47, %v291_v40 }
  0xb7   : > { %v302_v32 = vor.u32 %v301_v25, %v300_v24  ;;  %vm231_vm6 = vc.u32 %v713_v18, %v716_v19  ;;  %v232_v36 = vadd.s32 1, %v717_v20  ;;  %v305_v38 = vor.u32 %v304_v27, %v303_v26 }
  0xb8   : > { %vm309_vm7 = vcmp.lt.s32.totalorder %v703_v39, 1  ;;  %v308_v41 = vor.u32 %v307_v28, %v306_v33  ;;  %vm311_vm8 = vcmp.lt.s32.totalorder %v703_v39, 3  ;;  %vm312_vm9 = vcmp.lt.s32.totalorder %v703_v39, 4 }
  0xb9   : > { %v317_v42 = vsel %vm309_vm7, %v296_v21, %v299_v23  ;;  %v233_v35 = vsel %vm231_vm6, %v232_v36, %v717_v20  ;;  %v314_v43 = vsel %vm312_vm9, %v302_v32, 2102212464  ;;  %v318_v34 = vsel %vm312_vm9, %v305_v38, 920167782 }
  0xba   : > { %v321_v37 = vsel %vm309_vm7, %v299_v23, %v302_v32  ;;  %v234_v44 = vadd.s32 %v233_v35, %v229_v30  ;;  %vm310_vm10 = vcmp.lt.s32.totalorder %v703_v39, 2  ;;  %v319_v40 = vsel %vm311_vm8, %v302_v32, %v318_v34 }
  0xbb   : > { %v322_v45 = vsel %vm312_vm9, %v308_v41, 1326507024  ;;  %v313_v46 = vsel %vm309_vm7, %v293_v31, %v296_v21  ;;  %v315_v47 = vsel %vm311_vm8, %v299_v23, %v314_v43  ;;  %v320_v48 = vsel %vm310_vm10, %v317_v42, %v319_v40 }
  0xbc   : > { %v323_v49 = vsel %vm311_vm8, %v305_v38, %v322_v45  ;;  %v235_v50 = vadd.s32 536870912, %v234_v44  ;;  %v727_v52 = vmul.u32.u64.low %v325_v29, %v320_v48  ;;  %v728_v53 = vmul.u32.u64.high %v325_v29, %v320_v48, %v727_v52 }
  0xbd   : > { %v324_v51 = vsel %vm310_vm10, %v321_v37, %v323_v49  ;;  %v316_v57 = vsel %vm310_vm10, %v313_v46, %v315_v47  ;;  %v230_v9 = vadd.s32 %v716_v19, %v713_v18  ;;  %vm266_vm5 = vweird.f32 %v686_v15 }
  0xbe   : > { %v730_v54 = vmul.u32.u64.low %v325_v29, %v324_v51  ;;  %v731_v55 = vmul.u32.u64.high %v325_v29, %v324_v51, %v730_v54  ;;  %v236_v56 = vshrl.u32 %v235_v50, 30  ;;  %v335_v59 = vadd.s32 1, %v728_v53 }
  0xbf   : > { %v332_v39 = vmul.u32 %v325_v29, %v316_v57  ;;  %vm369_vm9 = vweird.f32 %v688_v16 }
  0xc0   : > { %v237_v58 = vshll.u32 %v236_v56, 30  ;;  %vm334_vm11 = vc.u32 %v731_v55, %v727_v52  ;;  %v333_v30 = vadd.s32 %v727_v52, %v731_v55  ;;  %v260_v34 = vsub.s32 4, %v236_v56 }
  0xc1   : > { %v336_v61 = vsel %vm334_vm11, %v335_v59, %v728_v53 }
  0xc2   : > { %v238_v60 = vsub.s32 %v234_v44, %v237_v58  ;;  %v337_v62 = vadd.s32 %v336_v61, %v332_v39  ;;  %v261_v46 = vsel %vm176_vm14, %v260_v34, %v236_v56 }
  0xc3   : > { %v263_v17 = vsel %vm741_vm15, 0, %v261_v46 }
  0xc4   : > { %v240_v63 = vsub.s32 0, %v238_v60  ;;  %v338_v0 = vadd.s32 536870912, %v337_v62  ;;  %v267_v53 = vand.u32 3, %v263_v17 }
  0xc6   : > { %v464_v1 = vmin.u32 %v240_v63, %v238_v60  ;;  %v339_v2 = vshrl.u32 %v338_v0, 30  ;;  %vm272_vm2 = vcmp.eq.s32.totalorder %v267_v53, 2  ;;  %vm269_vm3 = vcmp.eq.s32.totalorder %v267_v53, 0 }
  0xc7   : > { %vm268_vm4 = vcmp.lt.s32.totalorder %v267_v53, 2 }
  0xc8   : > { %v242_v3 = vclz %v464_v1  ;;  %v340_v4 = vshll.u32 %v339_v2, 30  ;;  %v363_v51 = vsub.s32 4, %v339_v2 }
  0xca   : > { %v465_v5 = vadd.s32 4294967294, %v242_v3  ;;  %v341_v6 = vsub.s32 %v337_v62, %v340_v4  ;;  %v364_v57 = vsel %vm279_vm0, %v363_v51, %v339_v2 }
  0xcb   : > { %v366_v39 = vsel %vm753_vm1, 0, %v364_v57 }
  0xcc   : > { %vm466_vm12 = vcmp.lt.s32.totalorder %v465_v5, 0  ;;  %v343_v8 = vsub.s32 0, %v341_v6  ;;  %v370_v62 = vand.u32 3, %v366_v39 }
  0xcd   : > { %v245_v7 = vsel %vm466_vm12, 0, %v465_v5 }
  0xce   : > { %v246_v10 = vsub.s32 32, %v245_v7  ;;  %v250_v11 = vsub.s32 4294967266, %v245_v7  ;;  %v468_v12 = vmin.u32 %v343_v8, %v341_v6  ;;  %v247_v13 = vshll.u32 %v238_v60, %v245_v7 }
  0xcf   : > { %vm375_vm6 = vcmp.eq.s32.totalorder %v370_v62, 2  ;;  %vm372_vm7 = vcmp.eq.s32.totalorder %v370_v62, 0  ;;  %vm371_vm8 = vcmp.lt.s32.totalorder %v370_v62, 2 }
  0xd0   : > { %v248_v14 = vshrl.u32 %v230_v9, %v246_v10  ;;  %v251_v20 = vadd.s32 127, %v250_v11  ;;  %v345_v21 = vclz %v468_v12 }
  0xd2   : > { %v249_v23 = vor.u32 %v248_v14, %v247_v13  ;;  %v252_v24 = vshll.u32 %v251_v20, 23  ;;  %v469_v25 = vadd.s32 4294967294, %v345_v21 }
  0xd4   : > { %v253_v26 = vor.u32 4788187, %v252_v24  ;;  %vm470_vm13 = vcmp.lt.s32.totalorder %v469_v25, 0  ;;  %v256_v28 = vcvt.s32.f32 %v249_v23 }
  0xd5   : > { %v348_v29 = vsel %vm470_vm13, 0, %v469_v25 }
  0xd6   : > { %v254_v27 = vand.u32 2147483647, %v253_v26  ;;  %v349_v31 = vsub.s32 32, %v348_v29  ;;  %v353_v32 = vsub.s32 4294967266, %v348_v29  ;;  %v350_v19 = vshll.u32 %v341_v6, %v348_v29 }
  0xd8   : > { %v257_v18 = vmul.f32 %v256_v28, %v254_v27  ;;  %v351_v33 = vshrl.u32 %v333_v30, %v349_v31  ;;  %v354_v36 = vadd.s32 127, %v353_v32 }
  0xda   : > { %v258_v38 = vxor.u32 2147483648, %v257_v18  ;;  %v352_v41 = vor.u32 %v351_v33, %v350_v19  ;;  %v355_v42 = vshll.u32 %v354_v36, 23 }
  0xdc   : > { %v259_v43 = vsel %vm176_vm14, %v258_v38, %v257_v18  ;;  %v356_v44 = vor.u32 4788187, %v355_v42  ;;  %v359_v45 = vcvt.s32.f32 %v352_v41 }
  0xdd   : > { %v262_v37 = vsel %vm741_vm15, %v686_v15, %v259_v43 }
  0xde   : > { %532 = vcosq.f32 %v262_v37  ;;  %v357_v40 = vand.u32 2147483647, %v356_v44 }
  0xdf   : > { %534 = vsinq.f32 %v262_v37 }
  0xe0   : > { %v360_v47 = vmul.f32 %v359_v45, %v357_v40 }
  0xe2   : > { %v361_v48 = vxor.u32 2147483648, %v360_v47 }
  0xe4   : > { %v362_v50 = vsel %vm279_vm0, %v361_v48, %v360_v47 }
  0xe5   : > { %v365_v52 = vsel %vm753_vm1, %v688_v16, %v362_v50 }
  0xe6   : > { %536 = vcosq.f32 %v365_v52 }
  0xe7   : > { %538 = vsinq.f32 %v365_v52 }
  0xe8   : > { %v533_v54 = vpop.eup %532 }
  0xe9   : > { %v535_v55 = vpop.eup %534  ;;  %v273_v56 = vxor.u32 2147483648, %v533_v54 }
  0xea   : > { %v270_v22 = vxor.u32 2147483648, %v535_v55 }
  0xeb   : > { %v274_v58 = vsel %vm272_vm2, %v273_v56, %v535_v55 }
  0xec   : > { %v271_v59 = vsel %vm269_vm3, %v533_v54, %v270_v22 }
  0xed   : > { %v275_v60 = vsel %vm268_vm4, %v271_v59, %v274_v58 }
  0xee   : > { %v276_v61 = vsel %vm266_vm5, nan, %v275_v60 }
  0xef   : > { %380 = vst [vmem:[%s134_s4] sm:$0xff] %v276_v61 }
  0xf0   : > { %v537_v63 = vpop.eup %536 }
  0xf1   : > { %v539_v0 = vpop.eup %538  ;;  %v376_v1 = vxor.u32 2147483648, %v537_v63 }
  0xf2   : > { %v373_v2 = vxor.u32 2147483648, %v539_v0 }
  0xf3   : > { %v377_v3 = vsel %vm375_vm6, %v376_v1, %v539_v0 }
  0xf4   : > { %v374_v4 = vsel %vm372_vm7, %v537_v63, %v373_v2 }
  0xf5   : > { %v378_v15 = vsel %vm371_vm8, %v374_v4, %v377_v3 }
  0xf6   : > { %v379_v5 = vsel %vm369_vm9, nan, %v378_v15 }
  0xf7   : > { %381 = vst [vmem:[%s134_s4 + $0x8] sm:$0xff] %v379_v5 }
  0xf8   : > { %553 = shalt.err (!%p550_p3)
}
  0xf9   : > { %s554_s23 = scalar_lea.hbm %s771_s14, 256  ;;  %s558_s26 = scalar_lea.hbm %s817_s2, 512 }
  0xfa   : > { %p555_p4 = scmp.ne.s32.totalorder %s771_s14, %s554_s23  ;;  %p559_p9 = scmp.lt.u32.totalorder %s771_s14, %s817_s2 }
  0xfb   : > { %p560_p10 = scmp.lt.u32.totalorder %s558_s26, %s554_s23  ;;  %p562_p12 = scmp.lt.u32.totalorder %s554_s23, %s771_s14 }
  0xfc   : > { %p556_p7 = pnand %p555_p4, %p665_p5 }
  0xfd   : > { %p561_p11 = por %p560_p10, %p559_p9 }
  0xfe   : > { %p557_p8 = pneg %p556_p7 }
  0xff   : > { %p563_p13 = por %p562_p12, %p561_p11 }
 0x101   : > { %p564_p0 = pnand %p563_p13, %p557_p8 }
 0x103   : > { %567 = shalt.err (!%p564_p0)
}
 0x104   : > { %485 = dma.vmem_to_hbm [thread:$0]  (%p665_p5), %s773_s6, 256, %s771_s14, %s383_s13  }
 0x105 PF: > { %p491_p1 = scmp.ge.s32.totalorder %s602_s12, 2  ;;  %s409_s29 = sand.u32 1, %s590_s9  }
 0x106   : > { %s410_s30 = scalar_lea.sflag [#allocation3], %s409_s29 }
 0x107   : > { %p488_p2 = pnand %p491_p1, %p669_p6 }
 0x109   : > { %585 = dma.done.wait (!%p488_p2), %s410_s30, 256  }
 0x10a   : > { %587 = vsyncadd (!%p488_p2), %s410_s30, 4294967040  ;;  %p12_p3 = scmp.ge.s32.totalorder %s652_s15, 4   ;;  %s824_s9 = smov %s594_s10 }
 0x10b   : > { %s825_s10 = smov %s598_s11  ;;  %s826_s11 = smov %s663_s18 }
 0x10c   : > { %s827_s12 = smov %s652_s15  ;;  %14 = sbr.rel (!%p12_p3) target bundleno = 3 (0x3), region = 64 }
 0x113   :  { %415 = vsyncpa [#allocation3], 1 }
 0x114   :  { %417 = vsyncpa [#allocation3 + $0x1], 1 }

</bundles_post_ra>
